<compile_context>
chip_gen: v6e
topology: v6e:2x2x1
jax: 0.10.0
libtpu: 0.0.40
codegen_flags: <defaults>
</compile_context>

<pallas_src>
import jax
import jax.numpy as jnp
from jax import lax
from jax.experimental import pallas as pl
from jax.experimental.pallas import tpu as pltpu


# ---------------------------------------------------------------------------
# Kernel 1: feature prep (runs once, all operands are small)
# ---------------------------------------------------------------------------
def prep_kernel(
    x_ref,
    w_fc_ref, b_fc_ref,            # stru_enc_fc : Linear(n_dim -> n_hidden) + act
    w_gat_ref, att_src_ref, att_dst_ref,   # GATConv weight + attention vectors (1 head)
    w_a1_ref, b_a1_ref, w_a2_ref, b_a2_ref,  # attr_enc : Linear(N->hid)+act, Linear(hid->E)
    h_ref, a_src_row_ref, a_dst_col_ref, za_ref,
):
    f32 = jnp.float32
    bf16 = jnp.bfloat16
    x = x_ref[...]

    # --- structure encoder: Linear + ReLU, then GAT linear transform ---
    h1 = jnp.dot(x.astype(bf16), w_fc_ref[...].astype(bf16),
                 preferred_element_type=f32) + b_fc_ref[...]
    h1 = jnp.maximum(h1, 0.0)
    h = jnp.dot(h1.astype(bf16), w_gat_ref[...].astype(bf16),
                preferred_element_type=f32)                     # [N, E]
    h_ref[...] = h

    # --- attention score projections ---
    # a_src needs to live on the lane axis later: compute it lane-dense [1, N]
    # via dot_general (one-shot); a_dst stays a column [N, 1] via a VPU reduce.
    a_src_row_ref[...] = lax.dot_general(
        att_src_ref[...], h, (((1,), (1,)), ((), ())), preferred_element_type=f32)
    a_dst_col_ref[...] = jnp.sum(h * att_dst_ref[...], axis=-1, keepdims=True)

    # --- attribute encoder: 2-layer MLP on x.T (no materialized transpose) ---
    za1 = lax.dot_general(x.astype(bf16), w_a1_ref[...].astype(bf16),
                          (((0,), (0,)), ((), ())),
                          preferred_element_type=f32) + b_a1_ref[...]
    za1 = jnp.maximum(za1, 0.0)
    za_ref[...] = jnp.dot(za1.astype(bf16), w_a2_ref[...].astype(bf16),
                          preferred_element_type=f32) + b_a2_ref[...]   # [n_dim, E]


# ---------------------------------------------------------------------------
# Kernel 2: GAT masked softmax attention, tiled over row blocks of N
# ---------------------------------------------------------------------------
def gat_attention_kernel(adj_ref, a_dst_ref, a_src_ref, h_ref, b_gat_ref, zv_ref):
    f32 = jnp.float32
    bf16 = jnp.bfloat16

    mask = adj_ref[...] != 0                         # [TM, N]  (adj is int8)
    e = a_dst_ref[...] + a_src_ref[...]              # [TM,1] + [1,N] -> [TM, N]
    e = jnp.maximum(e, 0.2 * e)                      # LeakyReLU(0.2)
    e = jnp.where(mask, e, jnp.float32(-1e30))       # softmax only over edges

    m = jnp.max(e, axis=-1, keepdims=True)
    p = jnp.exp(e - m)                               # masked entries underflow to 0
    denom = jnp.sum(p, axis=-1, keepdims=True)
    # NOTE: relies on self-loops being present in adj (every row has >=1 edge),
    # matching PyG GATConv(add_self_loops=True) semantics.
    attn = p * pl.reciprocal(denom, approx=True)

    zv = jnp.dot(attn.astype(bf16), h_ref[...].astype(bf16),
                 preferred_element_type=f32) + b_gat_ref[...]
    zv_ref[...] = jnp.maximum(zv, 0.0)               # act applied by the GCN wrapper


# ---------------------------------------------------------------------------
# Kernel 3: decoders, tiled over row blocks of N
# ---------------------------------------------------------------------------
def decoder_kernel(zv_tile_ref, zv_full_ref, za_ref, out_struct_ref, out_attr_ref):
    f32 = jnp.float32
    bf16 = jnp.bfloat16
    dn = (((1,), (1,)), ((), ()))                    # contract last dims (A @ B.T)

    zv_i = zv_tile_ref[...].astype(bf16)
    zv_all = zv_full_ref[...].astype(bf16)
    za = za_ref[...].astype(bf16)

    out_struct_ref[...] = lax.dot_general(zv_i, zv_all, dn, preferred_element_type=f32)
    out_attr_ref[...] = lax.dot_general(zv_i, za, dn, preferred_element_type=f32)


# ---------------------------------------------------------------------------
# Wrapper
# ---------------------------------------------------------------------------
def _vmem_limit_bytes():
    # Derive from hardware instead of hardcoding; keep ~25% headroom for the
    # compiler's double buffers / scratch (important on v7x, where physical
    # VMEM is only 64 MiB per TensorCore).
    try:
        info = pltpu.get_tpu_info()
        cap = int(getattr(info, "vmem_capacity_bytes", 128 << 20))
    except Exception:
        cap = 128 << 20
    return min((cap * 3) // 4, 100 << 20)


def anomaly_dae_forward(x, adj, params, row_tile=None):
    N, D = x.shape
    E = params["w_gat"].shape[1]
    f32 = jnp.float32
    vmem_limit = _vmem_limit_bytes()

    if row_tile is None:
        row_tile = next((c for c in (512, 256, 128, 64, 32, 16, 8) if N % c == 0), N)
    assert N % row_tile == 0 and row_tile % 8 == 0, "row_tile must divide N and be 8-aligned"
    n_tiles = N // row_tile

    def full0(shape):  # full-array block for the grid=() prep kernel
        return pl.BlockSpec(shape, lambda: tuple(0 for _ in shape))

    def full1(shape):  # full-array block, constant across a 1-D grid
        return pl.BlockSpec(shape, lambda i: tuple(0 for _ in shape))

    # ---- kernel 1: prep (single shot) ----
    prep_args = (
        x,
        params["w_fc"], params["b_fc"],
        params["w_gat"], params["att_src"], params["att_dst"],
        params["w_a1"], params["b_a1"], params["w_a2"], params["b_a2"],
    )
    h, a_src_row, a_dst_col, za = pl.pallas_call(
        prep_kernel,
        out_shape=(
            jax.ShapeDtypeStruct((N, E), f32),
            jax.ShapeDtypeStruct((1, N), f32),
            jax.ShapeDtypeStruct((N, 1), f32),
            jax.ShapeDtypeStruct((D, E), f32),
        ),
        grid=(),
        in_specs=[full0(a.shape) for a in prep_args],
        out_specs=(full0((N, E)), full0((1, N)), full0((N, 1)), full0((D, E))),
        compiler_params=pltpu.CompilerParams(vmem_limit_bytes=vmem_limit),
    )(*prep_args)

    # ---- kernel 2: attention, row-tiled, parallel across TCs ----
    zv = pl.pallas_call(
        gat_attention_kernel,
        out_shape=jax.ShapeDtypeStruct((N, E), f32),
        grid=(n_tiles,),
        in_specs=[
            pl.BlockSpec((row_tile, N), lambda i: (i, 0)),   # adj row tile (int8)
            pl.BlockSpec((row_tile, 1), lambda i: (i, 0)),   # a_dst tile
            full1((1, N)),                                   # a_src (lane-dense row)
            full1((N, E)),                                   # h (all nodes)
            full1(params["b_gat"].shape),                    # GAT bias
        ],
        out_specs=pl.BlockSpec((row_tile, E), lambda i: (i, 0)),
        compiler_params=pltpu.CompilerParams(
            dimension_semantics=("parallel",),
            vmem_limit_bytes=vmem_limit),
    )(adj, a_dst_col, a_src_row, h, params["b_gat"])

    # ---- kernel 3: decoders, row-tiled, parallel across TCs ----
    out_struct, out_attr = pl.pallas_call(
        decoder_kernel,
        out_shape=(
            jax.ShapeDtypeStruct((N, N), f32),
            jax.ShapeDtypeStruct((N, D), f32),
        ),
        grid=(n_tiles,),
        in_specs=[
            pl.BlockSpec((row_tile, E), lambda i: (i, 0)),   # zv row tile
            full1((N, E)),                                   # zv (transposed operand)
            full1((D, E)),                                   # za (transposed operand)
        ],
        out_specs=(
            pl.BlockSpec((row_tile, N), lambda i: (i, 0)),
            pl.BlockSpec((row_tile, D), lambda i: (i, 0)),
        ),
        compiler_params=pltpu.CompilerParams(
            dimension_semantics=("parallel",),
            vmem_limit_bytes=vmem_limit),
    )(zv, zv, za)

    return out_struct, out_attr


def make_params(key, node_num, n_dim, n_hidden, embed_dim):
    ks = jax.random.split(key, 10)
    s = 0.1
    return {
        # stru_enc_fc: Linear(n_dim, n_hidden)
        "w_fc": s * jax.random.normal(ks[0], (n_dim, n_hidden), jnp.float32),
        "b_fc": s * jax.random.normal(ks[1], (1, n_hidden), jnp.float32),
        # GATConv(n_hidden, embed_dim), 1 head
        "w_gat": s * jax.random.normal(ks[2], (n_hidden, embed_dim), jnp.float32),
        "att_src": s * jax.random.normal(ks[3], (1, embed_dim), jnp.float32),
        "att_dst": s * jax.random.normal(ks[4], (1, embed_dim), jnp.float32),
        "b_gat": s * jax.random.normal(ks[5], (1, embed_dim), jnp.float32),
        # attr_enc: Linear(node_num, n_hidden), Linear(n_hidden, embed_dim)
        "w_a1": s * jax.random.normal(ks[6], (node_num, n_hidden), jnp.float32),
        "b_a1": s * jax.random.normal(ks[7], (1, n_hidden), jnp.float32),
        "w_a2": s * jax.random.normal(ks[8], (n_hidden, embed_dim), jnp.float32),
        "b_a2": s * jax.random.normal(ks[9], (1, embed_dim), jnp.float32),
    }


def edge_index_to_adj(edge_index, node_num):
    # adj[dst, src] = 1 for every edge src -> dst, plus self loops
    # (PyG GATConv default). Stored int8 to quarter the dominant O(N^2) traffic.
    src, dst = edge_index
    adj = jnp.zeros((node_num, node_num), jnp.int8)
    adj = adj.at[dst, src].set(1)
    adj = adj.at[jnp.arange(node_num), jnp.arange(node_num)].set(1)
    return adj


if __name__ == "__main__":
    node_num, n_dim, n_hidden, embed_dim = 128, 16, 32, 32

    key = jax.random.PRNGKey(0)
    kx, kp = jax.random.split(key)
    x = jax.random.normal(kx, (node_num, n_dim), jnp.float32)

    # deterministic ring graph (bidirectional) as edge_index [2, num_edges]
    idx = jnp.arange(node_num)
    src = jnp.concatenate([idx, (idx + 1) % node_num])
    dst = jnp.concatenate([(idx + 1) % node_num, idx])
    edge_index = jnp.stack([src, dst])

    adj = edge_index_to_adj(edge_index, node_num)
    params = make_params(kp, node_num, n_dim, n_hidden, embed_dim)

    # row_tile=32 -> 4 row tiles: exercises the grid / pipelining even at demo size
    out_struct, out_attr = anomaly_dae_forward(x, adj, params, row_tile=32)
    jax.block_until_ready((out_struct, out_attr))

    assert out_struct.shape == (node_num, node_num)
    assert out_attr.shape == (node_num, n_dim)
    print("KERNEL_OK")
</pallas_src>

<mosaic_0001>
module attributes {stable_mosaic.version = 11 : i64} {
  func.func @prep_kernel(%arg0: memref<128x16xf32, #tpu.memory_space<vmem>>, %arg1: memref<16x32xf32, #tpu.memory_space<vmem>>, %arg2: memref<1x32xf32, #tpu.memory_space<vmem>>, %arg3: memref<32x32xf32, #tpu.memory_space<vmem>>, %arg4: memref<1x32xf32, #tpu.memory_space<vmem>>, %arg5: memref<1x32xf32, #tpu.memory_space<vmem>>, %arg6: memref<128x32xf32, #tpu.memory_space<vmem>>, %arg7: memref<1x32xf32, #tpu.memory_space<vmem>>, %arg8: memref<32x32xf32, #tpu.memory_space<vmem>>, %arg9: memref<1x32xf32, #tpu.memory_space<vmem>>, %arg10: memref<128x32xf32, #tpu.memory_space<vmem>>, %arg11: memref<1x128xf32, #tpu.memory_space<vmem>>, %arg12: memref<128x1xf32, #tpu.memory_space<vmem>>, %arg13: memref<16x32xf32, #tpu.memory_space<vmem>>) attributes {dimension_semantics = [], scalar_prefetch = 0 : i64, scratch_operands = 0 : i64, tpu.core_type = #tpu.core_type<tc>} {
    %c0 = arith.constant 0 : index
    %c0_0 = arith.constant 0 : index
    %0 = vector.load %arg0[%c0, %c0_0] : memref<128x16xf32, #tpu.memory_space<vmem>>, vector<128x16xf32>
    %1 = arith.truncf %0 : vector<128x16xf32> to vector<128x16xbf16>
    %c0_1 = arith.constant 0 : index
    %c0_2 = arith.constant 0 : index
    %2 = vector.load %arg1[%c0_1, %c0_2] : memref<16x32xf32, #tpu.memory_space<vmem>>, vector<16x32xf32>
    %3 = arith.truncf %2 : vector<16x32xf32> to vector<16x32xbf16>
    %cst = arith.constant dense<0.000000e+00> : vector<128x32xf32>
    %4 = tpu.matmul %1, %3, %cst {dimension_numbers = #tpu.dot_dimension_numbers<[1], [0], [0], [1], [0, 0, 1, 1], [], []>} : vector<128x16xbf16>, vector<16x32xbf16>, vector<128x32xf32> -> vector<128x32xf32>
    %c0_3 = arith.constant 0 : index
    %c0_4 = arith.constant 0 : index
    %5 = vector.load %arg2[%c0_3, %c0_4] : memref<1x32xf32, #tpu.memory_space<vmem>>, vector<1x32xf32>
    %6 = vector.broadcast %5 : vector<1x32xf32> to vector<128x32xf32>
    %7 = arith.addf %4, %6 : vector<128x32xf32>
    %cst_5 = arith.constant 0.000000e+00 : f32
    %8 = vector.broadcast %cst_5 : f32 to vector<128x32xf32>
    %9 = arith.maximumf %7, %8 : vector<128x32xf32>
    %10 = arith.truncf %9 : vector<128x32xf32> to vector<128x32xbf16>
    %c0_6 = arith.constant 0 : index
    %c0_7 = arith.constant 0 : index
    %11 = vector.load %arg3[%c0_6, %c0_7] : memref<32x32xf32, #tpu.memory_space<vmem>>, vector<32x32xf32>
    %12 = arith.truncf %11 : vector<32x32xf32> to vector<32x32xbf16>
    %cst_8 = arith.constant dense<0.000000e+00> : vector<128x32xf32>
    %13 = tpu.matmul %10, %12, %cst_8 {dimension_numbers = #tpu.dot_dimension_numbers<[1], [0], [0], [1], [0, 0, 1, 1], [], []>} : vector<128x32xbf16>, vector<32x32xbf16>, vector<128x32xf32> -> vector<128x32xf32>
    %c0_9 = arith.constant 0 : index
    %c0_10 = arith.constant 0 : index
    %14 = vector.load %arg10[%c0_9, %c0_10] : memref<128x32xf32, #tpu.memory_space<vmem>>, vector<128x32xf32>
    tpu.vector_store %arg10[%c0_9, %c0_10], %13 {strides = array<i32>} : memref<128x32xf32, #tpu.memory_space<vmem>>, vector<128x32xf32>,
    %c0_11 = arith.constant 0 : index
    %c0_12 = arith.constant 0 : index
    %15 = vector.load %arg4[%c0_11, %c0_12] : memref<1x32xf32, #tpu.memory_space<vmem>>, vector<1x32xf32>
    %cst_13 = arith.constant dense<0.000000e+00> : vector<1x128xf32>
    %16 = tpu.matmul %15, %13, %cst_13 {dimension_numbers = #tpu.dot_dimension_numbers<[1], [1], [0], [0], [0, 0, 1, 0], [], []>} : vector<1x32xf32>, vector<128x32xf32>, vector<1x128xf32> -> vector<1x128xf32>
    %c0_14 = arith.constant 0 : index
    %c0_15 = arith.constant 0 : index
    %17 = vector.load %arg11[%c0_14, %c0_15] : memref<1x128xf32, #tpu.memory_space<vmem>>, vector<1x128xf32>
    tpu.vector_store %arg11[%c0_14, %c0_15], %16 {strides = array<i32>} : memref<1x128xf32, #tpu.memory_space<vmem>>, vector<1x128xf32>,
    %c0_16 = arith.constant 0 : index
    %c0_17 = arith.constant 0 : index
    %18 = vector.load %arg5[%c0_16, %c0_17] : memref<1x32xf32, #tpu.memory_space<vmem>>, vector<1x32xf32>
    %19 = vector.broadcast %18 : vector<1x32xf32> to vector<128x32xf32>
    %20 = arith.mulf %13, %19 : vector<128x32xf32>
    %cst_18 = arith.constant dense<0.000000e+00> : vector<128xf32>
    %21 = vector.multi_reduction <add>, %20, %cst_18 [1] : vector<128x32xf32> to vector<128xf32>
    %22 = vector.shape_cast %21 : vector<128xf32> to vector<128x1xf32>
    %c0_19 = arith.constant 0 : index
    %c0_20 = arith.constant 0 : index
    %23 = vector.load %arg12[%c0_19, %c0_20] : memref<128x1xf32, #tpu.memory_space<vmem>>, vector<128x1xf32>
    tpu.vector_store %arg12[%c0_19, %c0_20], %22 {strides = array<i32>} : memref<128x1xf32, #tpu.memory_space<vmem>>, vector<128x1xf32>,
    %24 = arith.truncf %0 : vector<128x16xf32> to vector<128x16xbf16>
    %c0_21 = arith.constant 0 : index
    %c0_22 = arith.constant 0 : index
    %25 = vector.load %arg6[%c0_21, %c0_22] : memref<128x32xf32, #tpu.memory_space<vmem>>, vector<128x32xf32>
    %26 = arith.truncf %25 : vector<128x32xf32> to vector<128x32xbf16>
    %cst_23 = arith.constant dense<0.000000e+00> : vector<16x32xf32>
    %27 = tpu.matmul %24, %26, %cst_23 {dimension_numbers = #tpu.dot_dimension_numbers<[0], [0], [1], [1], [0, 1, 1, 1], [], []>} : vector<128x16xbf16>, vector<128x32xbf16>, vector<16x32xf32> -> vector<16x32xf32>
    %c0_24 = arith.constant 0 : index
    %c0_25 = arith.constant 0 : index
    %28 = vector.load %arg7[%c0_24, %c0_25] : memref<1x32xf32, #tpu.memory_space<vmem>>, vector<1x32xf32>
    %29 = vector.broadcast %28 : vector<1x32xf32> to vector<16x32xf32>
    %30 = arith.addf %27, %29 : vector<16x32xf32>
    %cst_26 = arith.constant 0.000000e+00 : f32
    %31 = vector.broadcast %cst_26 : f32 to vector<16x32xf32>
    %32 = arith.maximumf %30, %31 : vector<16x32xf32>
    %33 = arith.truncf %32 : vector<16x32xf32> to vector<16x32xbf16>
    %c0_27 = arith.constant 0 : index
    %c0_28 = arith.constant 0 : index
    %34 = vector.load %arg8[%c0_27, %c0_28] : memref<32x32xf32, #tpu.memory_space<vmem>>, vector<32x32xf32>
    %35 = arith.truncf %34 : vector<32x32xf32> to vector<32x32xbf16>
    %cst_29 = arith.constant dense<0.000000e+00> : vector<16x32xf32>
    %36 = tpu.matmul %33, %35, %cst_29 {dimension_numbers = #tpu.dot_dimension_numbers<[1], [0], [0], [1], [0, 0, 1, 1], [], []>} : vector<16x32xbf16>, vector<32x32xbf16>, vector<16x32xf32> -> vector<16x32xf32>
    %c0_30 = arith.constant 0 : index
    %c0_31 = arith.constant 0 : index
    %37 = vector.load %arg9[%c0_30, %c0_31] : memref<1x32xf32, #tpu.memory_space<vmem>>, vector<1x32xf32>
    %38 = vector.broadcast %37 : vector<1x32xf32> to vector<16x32xf32>
    %39 = arith.addf %36, %38 : vector<16x32xf32>
    %c0_32 = arith.constant 0 : index
    %c0_33 = arith.constant 0 : index
    %40 = vector.load %arg13[%c0_32, %c0_33] : memref<16x32xf32, #tpu.memory_space<vmem>>, vector<16x32xf32>
    tpu.vector_store %arg13[%c0_32, %c0_33], %39 {strides = array<i32>} : memref<16x32xf32, #tpu.memory_space<vmem>>, vector<16x32xf32>,
    return
  }
}

</mosaic_0001>

<bundles_post_ra>
// kernel: tpu_custom_call.1
= control target key start
LH: loop header
LB: loop body
LE: loop exit
PB: predicated region body
PF: predicated region fallthrough
CT: control target
= control target key end

     0   :  { %19 = vsyncpa [#allocation3], 0  ;;  %vm76_vm0 = vcmask 130048   ;;  %s1523_s0 = inlined_call_operand.vmem [shape: f32[128,16], index: 0, kind: input, shape index: {}]   ;;  %s1524_s1 = inlined_call_operand.vmem [shape: f32[16,32], index: 1, kind: input, shape index: {}]   ;;  %s1525_s2 = inlined_call_operand.vmem [shape: f32[1,32], index: 2, kind: input, shape index: {}]   ;;  %s1526_s3 = inlined_call_operand.vmem [shape: f32[32,32], index: 3, kind: input, shape index: {}]   ;;  %s1527_s4 = inlined_call_operand.vmem [shape: f32[1,32], index: 4, kind: input, shape index: {}]   ;;  %s1528_s5 = inlined_call_operand.vmem [shape: f32[1,32], index: 5, kind: input, shape index: {}]   ;;  %s1529_s6 = inlined_call_operand.vmem [shape: f32[128,32], index: 6, kind: input, shape index: {}]   ;;  %s1530_s7 = inlined_call_operand.vmem [shape: f32[1,32], index: 7, kind: input, shape index: {}]   ;;  %s1531_s8 = inlined_call_operand.vmem [shape: f32[32,32], index: 8, kind: input, shape index: {}]   ;;  %s1532_s9 = inlined_call_operand.vmem [shape: f32[1,32], index: 9, kind: input, shape index: {}]   ;;  %s1533_s10 = inlined_call_operand.vmem [shape: f32[128,32], index: 10, kind: output, shape index: {0}]   ;;  %s1534_s11 = inlined_call_operand.hbm [shape: f32[1,128], index: 11, kind: output, shape index: {1}]   ;;  %s1535_s12 = inlined_call_operand.vmem [shape: f32[128,1], index: 12, kind: output, shape index: {2}]   ;;  %s1536_s13 = inlined_call_operand.hbm [shape: f32[16,32], index: 13, kind: output, shape index: {3}]  }
   0x1   :  { %v66_v0 = vld [vmem:[%s1524_s1] sm:$0xff]  ;;  %v67_v1 = vld [vmem:[%s1524_s1 + $0x8] sm:$0xff]  ;;  %v44_v5 = vld [vmem:[%s1523_s0 + $0x10] sm:$0xff] }
   0x2   :  { %v42_v2 = vld [vmem:[%s1523_s0] sm:$0xff]  ;;  %v68_v3 = vpack.c.bf16 %v67_v1, %v66_v0  ;;  %v43_v4 = vld [vmem:[%s1523_s0 + $0x8] sm:$0xff]  ;;  %v45_v6 = vld [vmem:[%s1523_s0 + $0x18] sm:$0xff] }
   0x3   :  { %v58_v7 = vpack.c.bf16 %v43_v4, %v42_v2  ;;  %v46_v8 = vld [vmem:[%s1523_s0 + $0x20] sm:$0xff]  ;;  %v47_v9 = vld [vmem:[%s1523_s0 + $0x28] sm:$0xff]  ;;  %v59_v10 = vpack.c.bf16 %v45_v6, %v44_v5 }
   0x4   :  { %851 = vmatprep.subr.bf16.mxu0 %v68_v3  ;;  %v60_v11 = vpack.c.bf16 %v47_v9, %v46_v8 }
   0x5   :  { %852 = vmatpush3.bf16.msra.mxu0 %v68_v3  ;;  %853 = vmatprep.mubr.msk.bf16.mxu0 %vm76_vm0, %v58_v7 }
   0x6   :  { %608 = vxpose.xlu0.c.b16.start [1/8] (narrow) %v58_v7, 16 }
   0x7   :  { %20 = vsyncpa [#allocation5], 0  ;;  %v48_v12 = vld [vmem:[%s1523_s0 + $0x30] sm:$0xff]  ;;  %v49_v13 = vld [vmem:[%s1523_s0 + $0x38] sm:$0xff]  ;;  %v1002_v33 = vmov 0.0   ;;  %vm1003_vm1 = vmmov 0  }
   0x8   :  { %854 = vmatmul.mubr.msk.bf16.vlgmr.msra.gmra.mxu0 %vm76_vm0, %v59_v10  ;;  %v50_v14 = vld [vmem:[%s1523_s0 + $0x40] sm:$0xff]  ;;  %v51_v15 = vld [vmem:[%s1523_s0 + $0x48] sm:$0xff]  ;;  %v61_v16 = vpack.c.bf16 %v49_v13, %v48_v12  ;;  %v52_v18 = vld [vmem:[%s1523_s0 + $0x50] sm:$0xff]  ;;  %889 = vmatprep.subr.mxu0 %v1002_v33  ;;  %vm228_vm2 = vcmask 261120   ;;  %vm560_vm3 = vcmask 7168   ;;  %s1004_s26 = smov [#allocation4]  }
   0x9   :  { %857 = vmatprep.mubr.msk.bf16.mxu0 %vm76_vm0, %v60_v11  ;;  %v62_v17 = vpack.c.bf16 %v51_v15, %v50_v14  ;;  %v53_v19 = vld [vmem:[%s1523_s0 + $0x58] sm:$0xff]  ;;  %v54_v20 = vld [vmem:[%s1523_s0 + $0x60] sm:$0xff]  ;;  %v55_v21 = vld [vmem:[%s1523_s0 + $0x68] sm:$0xff]  ;;  %s746_s27 = sshll.u32 %s1004_s26, 4  ;;  %s747_s27 = int_to_ptr.vmem [resolvable:$true] %s746_s27 }
   0xa   :  { %609 = vxpose.xlu0.c.b16.cont [2/8] (narrow) %v59_v10, 16  ;;  %v63_v22 = vpack.c.bf16 %v53_v19, %v52_v18  ;;  %v64_v23 = vpack.c.bf16 %v55_v21, %v54_v20  ;;  %v56_v24 = vld [vmem:[%s1523_s0 + $0x70] sm:$0xff]  ;;  %v57_v25 = vld [vmem:[%s1523_s0 + $0x78] sm:$0xff]  ;;  %v222_v30 = vld [vmem:[%s1526_s3] sm:$0xff]  ;;  %s958_s28 = scalar_lea.vmem %s747_s27, 256  ;;  %p963_p1 = scmp.lt.s32.totalorder %s747_s27, %s747_s27 }
   0xb   :  { %v65_v26 = vpack.c.bf16 %v57_v25, %v56_v24  ;;  %v224_v27 = vld [vmem:[%s1526_s3 + $0x10] sm:$0xff]  ;;  %v225_v28 = vld [vmem:[%s1526_s3 + $0x18] sm:$0xff]  ;;  %v223_v31 = vld [vmem:[%s1526_s3 + $0x8] sm:$0xff]  ;;  %p959_p0 = scmp.ne.s32.totalorder %s747_s27, %s958_s28  ;;  %p964_p2 = scmp.lt.s32.totalorder %s958_s28, %s958_s28 }
   0xc   :  { %v227_v29 = vpack.c.bf16 %v225_v28, %v224_v27  ;;  %v226_v32 = vpack.c.bf16 %v223_v31, %v222_v30  ;;  %v1159_v36 = vld [vmem:[%s1525_s2] ss:$0 sm:$0xff]  ;;  %v591_v45 = vld [vmem:[%s1529_s6 + $0x70] sm:$0xff]  ;;  %v592_v46 = vld [vmem:[%s1529_s6 + $0x78] sm:$0xff] }
   0xd   :  { %v600_v52 = vpack.c.bf16 %v592_v46, %v591_v45  ;;  %v589_v55 = vld [vmem:[%s1529_s6 + $0x60] sm:$0xff]  ;;  %v590_v56 = vld [vmem:[%s1529_s6 + $0x68] sm:$0xff]  ;;  %v587_v1 = vld [vmem:[%s1529_s6 + $0x50] sm:$0xff]  ;;  %p965_p3 = por %p964_p2, %p963_p1 }
   0xe   :  { %610 = vxpose.xlu0.c.b16.cont [3/8] (narrow) %v60_v11, 16  ;;  %869 = vmatprep.subr.bf16.mxu1 %v227_v29  ;;  %v599_v62 = vpack.c.bf16 %v590_v56, %v589_v55  ;;  %v588_v2 = vld [vmem:[%s1529_s6 + $0x58] sm:$0xff]  ;;  %v585_v11 = vld [vmem:[%s1529_s6 + $0x40] sm:$0xff]  ;;  %v586_v12 = vld [vmem:[%s1529_s6 + $0x48] sm:$0xff] }
   0xf   :  { %870 = vmatpush3.bf16.msra.mxu1 %v227_v29  ;;  %v598_v8 = vpack.c.bf16 %v588_v2, %v587_v1  ;;  %v597_v18 = vpack.c.bf16 %v586_v12, %v585_v11  ;;  %v583_v21 = vld [vmem:[%s1529_s6 + $0x30] sm:$0xff]  ;;  %v581_v31 = vld [vmem:[%s1529_s6 + $0x20] sm:$0xff]  ;;  %p966_p4 = pnand %p965_p3, %p959_p0 }
  0x10   :  { %858 = vmatmul.mubr.msk.bf16.gmra.mxu0 %vm76_vm0, %v61_v16  ;;  %871 = vmatprep.subr.bf16.mxu1 %v226_v32  ;;  %v668_v56 = vld [vmem:[%s1531_s8] sm:$0xff] }
  0x11   :  { %861 = vmatprep.mubr.msk.bf16.mxu0 %vm76_vm0, %v62_v17 }
  0x12   :  { %611 = vxpose.xlu0.c.b16.cont [4/8] (narrow) %v61_v16, 16 }
  0x13   :  { %872 = vmatpush3.bf16.msra.mxu1 %v226_v32  ;;  %v582_v32 = vld [vmem:[%s1529_s6 + $0x28] sm:$0xff] }
  0x14   :  { %924 = vmatprep.subr.bf16.mxu1 %v1002_v33 }
  0x16   :  { %612 = vxpose.xlu0.c.b16.cont [5/8] (narrow) %v62_v17, 16 }
  0x18   :  { %862 = vmatmul.mubr.msk.bf16.gmra.mxu0 %vm76_vm0, %v63_v22 }
  0x19   :  { %865 = vmatprep.mubr.msk.bf16.mxu0 %vm76_vm0, %v64_v23 }
  0x1a   :  { %613 = vxpose.xlu0.c.b16.cont [6/8] (narrow) %v63_v22, 16  ;;  %v584_v22 = vld [vmem:[%s1529_s6 + $0x38] sm:$0xff] }
  0x1b   :  { %v596_v28 = vpack.c.bf16 %v584_v22, %v583_v21 }
  0x1e   :  { %614 = vxpose.xlu0.c.b16.cont [7/8] (narrow) %v64_v23, 16 }
  0x20   :  { %866 = vmatmul.mubr.msk.bf16.gmra.mxu0 %vm76_vm0, %v65_v26 }
  0x21   :  { %921 = vmatprep.mubr.msk.f32.mxu0 %vm1003_vm1, %v1002_v33 }
  0x22   :  { %615 = vxpose.xlu0.c.b16.end [8/8] (narrow) %v65_v26, 16 }
  0xc8   :  { %v855_v34 = vpop.f32.mrf.mxu0 }
  0xc9   :  { %v144_v40 = vadd.f32 %v855_v34, %v1159_v36 }
  0xca   :  { %v135_v35 = vpop.f32.mrf.mxu0 }
  0xcb   :  { %v136_v38 = vadd.f32 %v1159_v36, %v135_v35  ;;  %v200_v49 = vmax.f32 %v144_v40, 0.0  ;;  %v595_v40 = vpack.c.bf16 %v582_v32, %v581_v31 }
  0xcc   :  { %v856_v37 = vpop.f32.mrf.mxu0 }
  0xcd   :  { %v147_v39 = vadd.f32 %v856_v37, %v1159_v36  ;;  %v198_v47 = vmax.f32 %v136_v38, 0.0 }
  0xce   :  { %v138_v41 = vpop.f32.mrf.mxu0 }
  0xcf   :  { %v139_v42 = vadd.f32 %v1159_v36, %v138_v41  ;;  %v201_v43 = vmax.f32 %v147_v39, 0.0 }
  0xd0   :  { %v859_v44 = vpop.f32.mrf.mxu0 }
  0xd1   :  { %v199_v48 = vmax.f32 %v139_v42, 0.0  ;;  %v215_v53 = vpack.c.bf16 %v201_v43, %v200_v49  ;;  %v160_v59 = vadd.f32 %v859_v44, %v1159_v36  ;;  %v579_v42 = vld [vmem:[%s1529_s6 + $0x10] sm:$0xff]  ;;  %v580_v43 = vld [vmem:[%s1529_s6 + $0x18] sm:$0xff]  ;;  %v577_v49 = vld [vmem:[%s1529_s6] sm:$0xff] }
  0xd2   :  { %v151_v50 = vpop.f32.mrf.mxu0 }
  0xd3   :  { %v214_v51 = vpack.c.bf16 %v199_v48, %v198_v47  ;;  %v152_v57 = vadd.f32 %v1159_v36, %v151_v50  ;;  %v204_v5 = vmax.f32 %v160_v59, 0.0  ;;  %v594_v48 = vpack.c.bf16 %v580_v43, %v579_v42  ;;  %v578_v50 = vld [vmem:[%s1529_s6 + $0x8] sm:$0xff]  ;;  %v1261_v59 = vld [vmem:[%s1528_s5] ss:$0 sm:$0xff] }
  0xd4   :  { %v860_v54 = vpop.f32.mrf.mxu0 }
  0xd5   :  { %v163_v58 = vadd.f32 %v860_v54, %v1159_v36  ;;  %873 = vmatprep.mubr.msk.bf16.mxu1 %vm228_vm2, %v214_v51  ;;  %v202_v3 = vmax.f32 %v152_v57, 0.0  ;;  %v593_v51 = vpack.c.bf16 %v578_v50, %v577_v49  ;;  %v671_v54 = vld [vmem:[%s1531_s8 + $0x18] sm:$0xff]  ;;  %v669_v57 = vld [vmem:[%s1531_s8 + $0x8] sm:$0xff] }
  0xd6   :  { %v154_v60 = vpop.f32.mrf.mxu0  ;;  %874 = vmatmul.mubr.msk.bf16.vlgmr.msra.gmra.mxu1 %vm228_vm2, %v215_v53  ;;  %v670_v53 = vld [vmem:[%s1531_s8 + $0x10] sm:$0xff] }
  0xd7   :  { %v155_v61 = vadd.f32 %v1159_v36, %v154_v60  ;;  %925 = vmatpush3.bf16.msra.mxu1 %v600_v52  ;;  %v205_v63 = vmax.f32 %v163_v58, 0.0  ;;  %v616_v52 = vpop.trf.xlu0  ;;  %v673_v55 = vpack.c.bf16 %v671_v54, %v670_v53  ;;  %v672_v58 = vpack.c.bf16 %v669_v57, %v668_v56 }
  0xd8   :  { %v863_v0 = vpop.f32.mrf.mxu0  ;;  %926 = vmatprep.subr.bf16.mxu1 %v1002_v33 }
  0xd9   :  { %v203_v4 = vmax.f32 %v155_v61, 0.0  ;;  %v217_v9 = vpack.c.bf16 %v205_v63, %v204_v5  ;;  %v176_v15 = vadd.f32 %v863_v0, %v1159_v36 }
  0xda   :  { %v167_v6 = vpop.f32.mrf.mxu0 }
  0xdb   :  { %v216_v7 = vpack.c.bf16 %v203_v4, %v202_v3  ;;  %927 = vmatpush3.bf16.msra.mxu1 %v599_v62  ;;  %v168_v13 = vadd.f32 %v1159_v36, %v167_v6  ;;  %v208_v25 = vmax.f32 %v176_v15, 0.0 }
  0xdc   :  { %v864_v10 = vpop.f32.mrf.mxu0  ;;  %928 = vmatprep.subr.bf16.mxu1 %v1002_v33 }
  0xdd   :  { %v179_v14 = vadd.f32 %v864_v10, %v1159_v36  ;;  %877 = vmatprep.mubr.msk.bf16.mxu1 %vm228_vm2, %v216_v7  ;;  %v206_v23 = vmax.f32 %v168_v13, 0.0 }
  0xde   :  { %v170_v16 = vpop.f32.mrf.mxu0  ;;  %878 = vmatmul.mubr.msk.bf16.gmra.mxu1 %vm228_vm2, %v217_v9 }
  0xdf   :  { %v171_v17 = vadd.f32 %v1159_v36, %v170_v16  ;;  %929 = vmatpush3.bf16.msra.mxu1 %v598_v8  ;;  %v209_v19 = vmax.f32 %v179_v14, 0.0 }
  0xe0   :  { %v867_v20 = vpop.f32.mrf.mxu0  ;;  %930 = vmatprep.subr.bf16.mxu1 %v1002_v33 }
  0xe1   :  { %v207_v24 = vmax.f32 %v171_v17, 0.0  ;;  %v219_v29 = vpack.c.bf16 %v209_v19, %v208_v25  ;;  %v192_v37 = vadd.f32 %v867_v20, %v1159_v36 }
  0xe2   :  { %v183_v26 = vpop.f32.mrf.mxu0 }
  0xe3   :  { %v218_v27 = vpack.c.bf16 %v207_v24, %v206_v23  ;;  %931 = vmatpush3.bf16.msra.mxu1 %v597_v18  ;;  %v184_v34 = vadd.f32 %v1159_v36, %v183_v26  ;;  %v212_v46 = vmax.f32 %v192_v37, 0.0 }
  0xe4   :  { %v868_v30 = vpop.f32.mrf.mxu0  ;;  %932 = vmatprep.subr.bf16.mxu1 %v1002_v33 }
  0xe5   :  { %v195_v35 = vadd.f32 %v868_v30, %v1159_v36  ;;  %881 = vmatprep.mubr.msk.bf16.mxu1 %vm228_vm2, %v218_v27  ;;  %v210_v44 = vmax.f32 %v184_v34, 0.0 }
  0xe6   :  { %v186_v38 = vpop.f32.mrf.mxu0  ;;  %882 = vmatmul.mubr.msk.bf16.gmra.mxu1 %vm228_vm2, %v219_v29  ;;  %v800_v29 = vld [vmem:[%s1530_s7] ss:$0 sm:$0xff] }
  0xe7   :  { %v187_v39 = vadd.f32 %v1159_v36, %v186_v38  ;;  %933 = vmatpush3.bf16.msra.mxu1 %v596_v28  ;;  %v213_v41 = vmax.f32 %v195_v35, 0.0 }
  0xe8   :  { %934 = vmatprep.subr.bf16.mxu1 %v1002_v33 }
  0xe9   :  { %v211_v45 = vmax.f32 %v187_v39, 0.0  ;;  %v221_v36 = vpack.c.bf16 %v213_v41, %v212_v46 }
  0xeb   :  { %v220_v47 = vpack.c.bf16 %v211_v45, %v210_v44  ;;  %935 = vmatpush3.bf16.msra.mxu1 %v595_v40 }
  0xec   :  { %936 = vmatprep.subr.bf16.mxu1 %v1002_v33 }
  0xed   :  { %885 = vmatprep.mubr.msk.bf16.mxu1 %vm228_vm2, %v220_v47 }
  0xee   :  { %886 = vmatmul.mubr.msk.bf16.gmra.mxu1 %vm228_vm2, %v221_v36 }
  0xef   :  { %937 = vmatpush3.bf16.msra.mxu1 %v594_v48  ;;  %940 = vmatprep.mubr.msk.bf16.mxu1 %vm1003_vm1, %v1002_v33 }
  0xf0   :  { %938 = vmatprep.subr.bf16.mxu1 %v1002_v33 }
  0xf3   :  { %939 = vmatpush3.bf16.msra.mxu1 %v593_v51 }
  0xf4   :  { %944 = vmatprep.subr.bf16.mxu1 %v1002_v33 }
  0xf6   :  { %941 = vmatmul.mubr.bf16.vlgmr.msra.gmra.mxu1 %v616_v52 }
  0xf7   :  { %948 = vmatprep.mubr.msk.bf16.mxu1 %vm1003_vm1, %v1002_v33  ;;  %945 = vmatpush3.bf16.msra.mxu1 %v673_v55  ;;  %v366_v55 = vld [vmem:[%s1527_s4] sm:$0x1] }
  0xf8   :  { %946 = vmatprep.subr.bf16.mxu1 %v1002_v33 }
  0xfb   :  { %947 = vmatpush3.bf16.msra.mxu1 %v672_v58 }
 0x196   :  { %v1263_v60 = vpop.f32.mrf.mxu1 }
 0x197   :  { %352 = vst.msk [vmem:[%s1533_s10 + $0x10] sm:$0xff] %vm228_vm2, %v1263_v60  ;;  %v498_v61 = vmul.f32 %v1263_v60, %v1261_v59 }
 0x198   :  { %v1272_v62 = vpop.f32.mrf.mxu1 }
 0x199   :  { %350 = vst.msk [vmem:[%s1533_s10] sm:$0xff] %vm228_vm2, %v1272_v62  ;;  %v518_v63 = vsel %vm228_vm2, %v498_v61, 0.0  ;;  %v496_v0 = vmul.f32 %v1261_v59, %v1272_v62 }
 0x19a   :  { %519 = vadd.xlane.f32.xlu1 %v518_v63  ;;  %v1282_v1 = vpop.f32.mrf.mxu1 }
 0x19b   :  { %353 = vst.msk [vmem:[%s1533_s10 + $0x18] sm:$0xff] %vm228_vm2, %v1282_v1  ;;  %v512_v3 = vsel %vm228_vm2, %v496_v0, 0.0  ;;  %v499_v4 = vmul.f32 %v1282_v1, %v1261_v59 }
 0x19c   :  { %v1289_v2 = vpop.f32.mrf.mxu1 }
 0x19d   :  { %351 = vst.msk [vmem:[%s1533_s10 + $0x8] sm:$0xff] %vm228_vm2, %v1289_v2  ;;  %v521_v7 = vsel %vm228_vm2, %v499_v4, 0.0  ;;  %v497_v8 = vmul.f32 %v1261_v59, %v1289_v2 }
 0x19e   :  { %513 = vadd.xlane.f32.xlu1 %v512_v3  ;;  %v1299_v5 = vpop.f32.mrf.mxu1 }
 0x19f   :  { %356 = vst.msk [vmem:[%s1533_s10 + $0x30] sm:$0xff] %vm228_vm2, %v1299_v5  ;;  %v515_v11 = vsel %vm228_vm2, %v497_v8, 0.0  ;;  %v502_v12 = vmul.f32 %v1299_v5, %v1261_v59 }
 0x1a0   :  { %v1306_v6 = vpop.f32.mrf.mxu1 }
 0x1a1   :  { %354 = vst.msk [vmem:[%s1533_s10 + $0x20] sm:$0xff] %vm228_vm2, %v1306_v6  ;;  %v530_v15 = vsel %vm228_vm2, %v502_v12, 0.0  ;;  %v500_v17 = vmul.f32 %v1261_v59, %v1306_v6 }
 0x1a2   :  { %522 = vadd.xlane.f32.xlu1 %v521_v7  ;;  %v1316_v9 = vpop.f32.mrf.mxu1  ;;  %v801_v7 = vld [vmem:[%s1532_s9] ss:$0 sm:$0xff] }
 0x1a3   :  { %357 = vst.msk [vmem:[%s1533_s10 + $0x38] sm:$0xff] %vm228_vm2, %v1316_v9  ;;  %v524_v21 = vsel %vm228_vm2, %v500_v17, 0.0  ;;  %v503_v22 = vmul.f32 %v1316_v9, %v1261_v59 }
 0x1a4   :  { %v1323_v10 = vpop.f32.mrf.mxu1 }
 0x1a5   :  { %355 = vst.msk [vmem:[%s1533_s10 + $0x28] sm:$0xff] %vm228_vm2, %v1323_v10  ;;  %v533_v25 = vsel %vm228_vm2, %v503_v22, 0.0  ;;  %v501_v26 = vmul.f32 %v1261_v59, %v1323_v10 }
 0x1a6   :  { %516 = vadd.xlane.f32.xlu1 %v515_v11  ;;  %v1333_v13 = vpop.f32.mrf.mxu1 }
 0x1a7   :  { %360 = vst.msk [vmem:[%s1533_s10 + $0x50] sm:$0xff] %vm228_vm2, %v1333_v13  ;;  %v527_v30 = vsel %vm228_vm2, %v501_v26, 0.0  ;;  %v506_v32 = vmul.f32 %v1333_v13, %v1261_v59 }
 0x1a8   :  { %v1340_v14 = vpop.f32.mrf.mxu1 }
 0x1a9   :  { %358 = vst.msk [vmem:[%s1533_s10 + $0x40] sm:$0xff] %vm228_vm2, %v1340_v14  ;;  %v504_v16 = vmul.f32 %v1261_v59, %v1340_v14  ;;  %v542_v40 = vsel %vm228_vm2, %v506_v32, 0.0 }
 0x1aa   :  { %531 = vadd.xlane.f32.xlu1 %v530_v15  ;;  %v884_v18 = vpop.f32.mrf.mxu1 }
 0x1ab   :  { %361 = vst.msk [vmem:[%s1533_s10 + $0x58] sm:$0xff] %vm228_vm2, %v884_v18  ;;  %v536_v19 = vsel %vm228_vm2, %v504_v16, 0.0  ;;  %v507_v41 = vmul.f32 %v884_v18, %v1261_v59 }
 0x1ac   :  { %537 = vadd.xlane.f32.xlu0 %v536_v19  ;;  %v322_v20 = vpop.f32.mrf.mxu1 }
 0x1ad   :  { %359 = vst.msk [vmem:[%s1533_s10 + $0x48] sm:$0xff] %vm228_vm2, %v322_v20  ;;  %v545_v47 = vsel %vm228_vm2, %v507_v41, 0.0  ;;  %v505_v48 = vmul.f32 %v1261_v59, %v322_v20 }
 0x1ae   :  { %525 = vadd.xlane.f32.xlu1 %v524_v21  ;;  %v887_v23 = vpop.f32.mrf.mxu1 }
 0x1af   :  { %364 = vst.msk [vmem:[%s1533_s10 + $0x70] sm:$0xff] %vm228_vm2, %v887_v23  ;;  %v539_v50 = vsel %vm228_vm2, %v505_v48, 0.0  ;;  %v510_v53 = vmul.f32 %v887_v23, %v1261_v59 }
 0x1b0   :  { %v335_v24 = vpop.f32.mrf.mxu1 }
 0x1b1   :  { %362 = vst.msk [vmem:[%s1533_s10 + $0x60] sm:$0xff] %vm228_vm2, %v335_v24  ;;  %v508_v51 = vmul.f32 %v1261_v59, %v335_v24  ;;  %v554_v54 = vsel %vm228_vm2, %v510_v53, 0.0 }
 0x1b2   :  { %534 = vadd.xlane.f32.xlu1 %v533_v25  ;;  %v888_v27 = vpop.f32.mrf.mxu1 }
 0x1b3   :  { %365 = vst.msk [vmem:[%s1533_s10 + $0x78] sm:$0xff] %vm228_vm2, %v888_v27  ;;  %890 = vmatpush3.xpose.msk.msra.mxu0 %vm228_vm2, %v888_v27  ;;  %v511_v37 = vmul.f32 %v888_v27, %v1261_v59  ;;  %v548_v52 = vsel %vm228_vm2, %v508_v51, 0.0 }
 0x1b4   :  { %v338_v28 = vpop.f32.mrf.mxu1  ;;  %891 = vmatprep.subr.mxu0 %v1002_v33 }
 0x1b5   :  { %363 = vst.msk [vmem:[%s1533_s10 + $0x68] sm:$0xff] %vm228_vm2, %v338_v28  ;;  %v509_v31 = vmul.f32 %v1261_v59, %v338_v28  ;;  %v557_v43 = vsel %vm228_vm2, %v511_v37, 0.0 }
 0x1b6   :  { %528 = vadd.xlane.f32.xlu1 %v527_v30  ;;  %v658_v34 = vpop.f32.mrf.mxu1 }
 0x1b7   :  { %892 = vmatpush3.xpose.msk.msra.mxu0 %vm228_vm2, %v887_v23  ;;  %v551_v35 = vsel %vm228_vm2, %v509_v31, 0.0  ;;  %v659_v38 = vadd.f32 %v800_v29, %v658_v34 }
 0x1b8   :  { %552 = vadd.xlane.f32.xlu0 %v551_v35  ;;  %893 = vmatprep.subr.mxu0 %v1002_v33  ;;  %v942_v39 = vpop.f32.mrf.mxu1 }
 0x1b9   :  { %v665_v44 = vmax.f32 %v659_v38, 0.0 }
 0x1ba   :  { %543 = vadd.xlane.f32.xlu1 %v542_v40  ;;  %v661_v42 = vpop.f32.mrf.mxu1 }
 0x1bb   :  { %894 = vmatpush3.xpose.msk.msra.mxu0 %vm228_vm2, %v338_v28  ;;  %v662_v45 = vadd.f32 %v800_v29, %v661_v42 }
 0x1bc   :  { %558 = vadd.xlane.f32.xlu0 %v557_v43  ;;  %895 = vmatprep.subr.mxu0 %v1002_v33  ;;  %v943_v46 = vpop.f32.mrf.mxu1 }
 0x1bd   :  { %v666_v36 = vmax.f32 %v662_v45, 0.0 }
 0x1be   :  { %546 = vadd.xlane.f32.xlu1 %v545_v47 }
 0x1bf   :  { %896 = vmatpush3.xpose.msk.msra.mxu0 %vm228_vm2, %v335_v24  ;;  %v667_v49 = vpack.c.bf16 %v666_v36, %v665_v44 }
 0x1c0   :  { %897 = vmatprep.subr.mxu0 %v1002_v33 }
 0x1c1   :  { %949 = vmatmul.mubr.msk.bf16.vlgmr.msra.gmra.mxu1 %vm228_vm2, %v667_v49 }
 0x1c2   :  { %540 = vadd.xlane.f32.xlu1 %v539_v50 }
 0x1c3   :  { %898 = vmatpush3.xpose.msk.msra.mxu0 %vm228_vm2, %v884_v18 }
 0x1c4   :  { %899 = vmatprep.subr.mxu0 %v1002_v33 }
 0x1c6   :  { %549 = vadd.xlane.f32.xlu1 %v548_v52 }
 0x1c7   :  { %900 = vmatpush3.xpose.msk.msra.mxu0 %vm228_vm2, %v1333_v13 }
 0x1c8   :  { %901 = vmatprep.subr.mxu0 %v1002_v33 }
 0x1ca   :  { %555 = vadd.xlane.f32.xlu1 %v554_v54 }
 0x1cb   :  { %902 = vmatpush3.xpose.msk.msra.mxu0 %vm228_vm2, %v322_v20 }
 0x1cc   :  { %903 = vmatprep.subr.mxu0 %v1002_v33 }
 0x1cf   :  { %904 = vmatpush3.xpose.msk.msra.mxu0 %vm228_vm2, %v1340_v14 }
 0x1d0   :  { %905 = vmatprep.subr.mxu0 %v1002_v33 }
 0x1d3   :  { %906 = vmatpush3.xpose.msk.msra.mxu0 %vm228_vm2, %v1316_v9 }
 0x1d4   :  { %907 = vmatprep.subr.mxu0 %v1002_v33 }
 0x1d7   :  { %908 = vmatpush3.xpose.msk.msra.mxu0 %vm228_vm2, %v1299_v5 }
 0x1d8   :  { %909 = vmatprep.subr.mxu0 %v1002_v33 }
 0x1db   :  { %910 = vmatpush3.xpose.msk.msra.mxu0 %vm228_vm2, %v1323_v10 }
 0x1dc   :  { %911 = vmatprep.subr.mxu0 %v1002_v33 }
 0x1df   :  { %912 = vmatpush3.xpose.msk.msra.mxu0 %vm228_vm2, %v1306_v6 }
 0x1e0   :  { %913 = vmatprep.subr.mxu0 %v1002_v33 }
 0x1e3   :  { %914 = vmatpush3.xpose.msk.msra.mxu0 %vm228_vm2, %v1282_v1 }
 0x1e4   :  { %915 = vmatprep.subr.mxu0 %v1002_v33 }
 0x1e7   :  { %916 = vmatpush3.xpose.msk.msra.mxu0 %vm228_vm2, %v1263_v60 }
 0x1e8   :  { %917 = vmatprep.subr.mxu0 %v1002_v33 }
 0x1eb   :  { %918 = vmatpush3.xpose.msk.msra.mxu0 %vm228_vm2, %v1289_v2 }
 0x1ec   :  { %919 = vmatprep.subr.mxu0 %v1002_v33 }
 0x1ef   :  { %920 = vmatpush3.xpose.msk.msra.mxu0 %vm228_vm2, %v1272_v62 }
 0x1f2   :  { %922 = vmatmul.mubr.msk.f32.vlgmr.msra.gmra.mxu0 %vm228_vm2, %v366_v55 }
 0x223   :  { %v520_v56 = vpop.xlane.xlu1 %519 }
 0x224   :  { %563 = vst.msk [vmem:[%s1535_s12 + $0x10] sm:$0xff] %vm560_vm3, %v520_v56 }
 0x227   :  { %v514_v57 = vpop.xlane.xlu1 %513 }
 0x228   :  { %561 = vst.msk [vmem:[%s1535_s12] sm:$0xff] %vm560_vm3, %v514_v57 }
 0x22b   :  { %v523_v33 = vpop.xlane.xlu1 %522 }
 0x22c   :  { %564 = vst.msk [vmem:[%s1535_s12 + $0x18] sm:$0xff] %vm560_vm3, %v523_v33 }
 0x22f   :  { %v517_v58 = vpop.xlane.xlu1 %516 }
 0x230   :  { %562 = vst.msk [vmem:[%s1535_s12 + $0x8] sm:$0xff] %vm560_vm3, %v517_v58 }
 0x233   :  { %v532_v59 = vpop.xlane.xlu1 %531 }
 0x234   :  { %567 = vst.msk [vmem:[%s1535_s12 + $0x30] sm:$0xff] %vm560_vm3, %v532_v59 }
 0x235   :  { %v538_v60 = vpop.xlane.xlu0 %537 }
 0x236   :  { %569 = vst.msk [vmem:[%s1535_s12 + $0x40] sm:$0xff] %vm560_vm3, %v538_v60 }
 0x237   :  { %v526_v61 = vpop.xlane.xlu1 %525 }
 0x238   :  { %565 = vst.msk [vmem:[%s1535_s12 + $0x20] sm:$0xff] %vm560_vm3, %v526_v61 }
 0x23b   :  { %v535_v62 = vpop.xlane.xlu1 %534 }
 0x23c   :  { %568 = vst.msk [vmem:[%s1535_s12 + $0x38] sm:$0xff] %vm560_vm3, %v535_v62 }
 0x23f   :  { %v529_v63 = vpop.xlane.xlu1 %528 }
 0x240   :  { %566 = vst.msk [vmem:[%s1535_s12 + $0x28] sm:$0xff] %vm560_vm3, %v529_v63 }
 0x241   :  { %v553_v0 = vpop.xlane.xlu0 %552 }
 0x242   :  { %574 = vst.msk [vmem:[%s1535_s12 + $0x68] sm:$0xff] %vm560_vm3, %v553_v0 }
 0x243   :  { %v544_v1 = vpop.xlane.xlu1 %543 }
 0x244   :  { %571 = vst.msk [vmem:[%s1535_s12 + $0x50] sm:$0xff] %vm560_vm3, %v544_v1 }
 0x245   :  { %v559_v2 = vpop.xlane.xlu0 %558 }
 0x246   :  { %576 = vst.msk [vmem:[%s1535_s12 + $0x78] sm:$0xff] %vm560_vm3, %v559_v2 }
 0x247   :  { %v547_v3 = vpop.xlane.xlu1 %546 }
 0x248   :  { %572 = vst.msk [vmem:[%s1535_s12 + $0x58] sm:$0xff] %vm560_vm3, %v547_v3 }
 0x24b   :  { %v541_v4 = vpop.xlane.xlu1 %540 }
 0x24c   :  { %570 = vst.msk [vmem:[%s1535_s12 + $0x48] sm:$0xff] %vm560_vm3, %v541_v4 }
 0x24f   :  { %v550_v5 = vpop.xlane.xlu1 %549 }
 0x250   :  { %573 = vst.msk [vmem:[%s1535_s12 + $0x60] sm:$0xff] %vm560_vm3, %v550_v5 }
 0x253   :  { %v556_v6 = vpop.xlane.xlu1 %555 }
 0x254   :  { %575 = vst.msk [vmem:[%s1535_s12 + $0x70] sm:$0xff] %vm560_vm3, %v556_v6 }
 0x281   :  { %v718_v8 = vpop.f32.mrf.mxu1 }
 0x282   :  { %v719_v9 = vadd.f32 %v801_v7, %v718_v8 }
 0x283   :  { %v950_v10 = vpop.f32.mrf.mxu1 }
 0x284   :  { %725 = vst.msk [vmem:[#allocation4] sm:$0xff] %vm228_vm2, %v719_v9 }
 0x285   :  { %v721_v11 = vpop.f32.mrf.mxu1 }
 0x286   :  { %v722_v12 = vadd.f32 %v801_v7, %v721_v11 }
 0x287   :  { %v951_v13 = vpop.f32.mrf.mxu1 }
 0x288   :  { %726 = vst.msk [vmem:[#allocation4 + $0x8] sm:$0xff] %vm228_vm2, %v722_v12 }
 0x289   :  { %969 = shalt.err (!%p966_p4)
}
 0x28a   :  { %s1005_s9 = smov 128   ;;  %s1006_s12 = smov 8  }
 0x28b   :  { %752 = dma.vmem_to_hbm [thread:$0]  %s747_s27, 256, %s1536_s13, [#allocation5], %s1005_s9, %s1005_s9, %s1006_s12  }
 0x28c   :  { %s1007_s0 = smov [#allocation2]  }
 0x28d   :  { %s735_s14 = sshll.u32 %s1007_s0, 4  ;;  %s736_s14 = int_to_ptr.vmem [resolvable:$true] %s735_s14 }
 0x28e   :  { %s978_s15 = scalar_lea.vmem %s736_s14, 16  ;;  %s982_s16 = scalar_lea.vmem %s736_s14, 32 }
 0x28f   :  { %p979_p5 = scmp.ne.s32.totalorder %s736_s14, %s978_s15  ;;  %p983_p6 = scmp.lt.s32.totalorder %s736_s14, %s736_s14 }
 0x290   :  { %p984_p7 = scmp.lt.s32.totalorder %s982_s16, %s978_s15 }
 0x292   :  { %p985_p8 = por %p984_p7, %p983_p6 }
 0x294   :  { %p986_p9 = pnand %p985_p8, %p979_p5 }
 0x2b2   :  { %v484_v14 = vpop.f32.mrf.mxu0 }
 0x2b3   :  { %488 = vst [vmem:[#allocation2] sm:$0x1] %v484_v14 }
 0x2b4   :  { %v923_v15 = vpop.f32.mrf.mxu0 }
 0x2b5   :  { %989 = shalt.err (!%p986_p9)
}
 0x2b6   :  { %738 = dma.vmem_to_hbm [thread:$0]  %s736_s14, 16, %s1534_s11, [#allocation3]  }
 0x2b7   :  { %998 = dma.done.wait [#allocation3], 16  }
 0x2b8   :  { %999 = vsyncadd [#allocation3], 4294967280 }
 0x2b9   :  { %1000 = dma.done.wait [#allocation5], 256  }
 0x2ba   :  { %1001 = vsyncadd [#allocation5], 4294967040 }
 0x2bb   :  { %763 = vsyncpa [#allocation3], 1 }
 0x2bc   :  { %764 = vsyncpa [#allocation5], 1 }

</bundles_post_ra>
